<compile_context>
chip_gen: v5e
topology: v5e:2x2
jax: 0.10.0
libtpu: 0.0.40
codegen_flags: <defaults>
</compile_context>

<pallas_src>
import functools

import jax
import jax.numpy as jnp
from jax.experimental import pallas as pl
from jax.experimental.pallas import tpu as pltpu


def _round_up(v, m):
    return ((v + m - 1) // m) * m


# Per-step VMEM budget for the double-buffered x/y/out tiles plus f32
# intermediates.  Chosen to fit under the *smallest* default scoped-VMEM
# limit across generations (v5e: 16 MiB) so no override is ever required,
# which also keeps v7x (64 MiB physical VMEM) comfortable.
_VMEM_BUDGET_BYTES = 10 * 1024 * 1024
_MAX_ROW_TILE = 1024
_MIN_SPLIT_ROWS = 512          # split single-block problems so v7x gets 2 grid steps
_SMALL_FALLBACK_ELEMS = 4096   # below this, plain jnp beats pallas_call overhead


def _addnorm_kernel(x_ref, y_ref, g_ref, b_ref, o_ref, *, d, eps):
    # x_ref / y_ref / o_ref: (block_rows, d) tiles; g_ref / b_ref: (1, d) resident.
    # Accumulate statistics in f32 regardless of the I/O dtype.
    z = x_ref[...].astype(jnp.float32) + y_ref[...].astype(jnp.float32)

    inv_d = 1.0 / float(d)
    # One traversal of z: fused mean / E[z^2]  (var = E[z^2] - mean^2).
    mean = jnp.sum(z, axis=-1, keepdims=True) * inv_d
    mean_sq = jnp.sum(z * z, axis=-1, keepdims=True) * inv_d
    var = jnp.maximum(mean_sq - mean * mean, 0.0)  # guard tiny cancellation
    inv_std = jax.lax.rsqrt(var + eps)

    out = (z - mean) * inv_std * g_ref[...] + b_ref[...]
    o_ref[...] = out.astype(o_ref.dtype)


def _reference_addnorm(x, y, gamma, beta, eps=1e-5):
    """Pure-jnp reference (two-pass LayerNorm, f32 accumulation)."""
    z = (x.astype(jnp.float32) + y.astype(jnp.float32))
    mean = z.mean(axis=-1, keepdims=True)
    var = ((z - mean) ** 2).mean(axis=-1, keepdims=True)
    out = (z - mean) / jnp.sqrt(var + eps)
    out = out * gamma.astype(jnp.float32) + beta.astype(jnp.float32)
    return out.astype(x.dtype)


def add_norm(x, y, gamma, beta, *, eps=1e-5, tm=_MAX_ROW_TILE, use_pallas=None):
    """LayerNorm(dropout(y) + x), dropout in eval mode (identity).

    x, y: (..., d); gamma, beta: (d,).
    """
    assert x.shape == y.shape
    orig_shape = x.shape
    d = orig_shape[-1]
    M = 1
    for s in orig_shape[:-1]:
        M *= s

    if use_pallas is None:
        use_pallas = (M * d) >= _SMALL_FALLBACK_ELEMS
    if not use_pallas:
        # Small-problem fallback: XLA's fused elementwise+reduce wins here.
        return _reference_addnorm(x, y, gamma, beta, eps)

    x2d = x.reshape(M, d)
    y2d = y.reshape(M, d)
    gamma_r = gamma.reshape(1, d).astype(jnp.float32)
    beta_r = beta.reshape(1, d).astype(jnp.float32)

    itemsize = jnp.dtype(x.dtype).itemsize
    # 3 double-buffered I/O tiles (x, y, out) + ~4 f32 intermediates per row.
    bytes_per_row = d * (3 * 2 * itemsize + 4 * 4)
    tm_cap = max(8, (_VMEM_BUDGET_BYTES // bytes_per_row) // 8 * 8)
    tm_eff = max(8, (min(tm, tm_cap, _MAX_ROW_TILE) // 8) * 8)

    if M <= tm_eff:
        if M >= _MIN_SPLIT_ROWS:
            # Big enough to matter: keep >= 2 grid steps so both v7x
            # TensorCores get work under dimension_semantics=("parallel",).
            block_rows = _round_up(pl.cdiv(M, 2), 8)
        else:
            block_rows = M  # full-extent block: always a legal block shape
    else:
        block_rows = tm_eff

    grid = (pl.cdiv(M, block_rows),)  # ragged last block masked by Pallas

    kernel = functools.partial(_addnorm_kernel, d=d, eps=float(eps))

    grid_spec = pltpu.PrefetchScalarGridSpec(
        num_scalar_prefetch=0,
        grid=grid,
        in_specs=[
            pl.BlockSpec((block_rows, d), lambda i: (i, 0)),  # X row tile
            pl.BlockSpec((block_rows, d), lambda i: (i, 0)),  # Y row tile
            pl.BlockSpec((1, d), lambda i: (0, 0)),           # gamma (resident, f32)
            pl.BlockSpec((1, d), lambda i: (0, 0)),           # beta  (resident, f32)
        ],
        out_specs=pl.BlockSpec((block_rows, d), lambda i: (i, 0)),
    )

    out2d = pl.pallas_call(
        kernel,
        out_shape=jax.ShapeDtypeStruct((M, d), x.dtype),
        grid_spec=grid_spec,
        compiler_params=pltpu.CompilerParams(
            dimension_semantics=("parallel",)),
    )(x2d, y2d, gamma_r, beta_r)

    return out2d.reshape(orig_shape)


if __name__ == "__main__":
    # Small shapes consistent with the module's forward: X, Y: (batch, seq, hidden)
    batch, seq, hidden = 2, 8, 32

    key = jax.random.PRNGKey(0)
    k_x, k_y, k_g, k_b, k_x2, k_y2 = jax.random.split(key, 6)

    x = jax.random.normal(k_x, (batch, seq, hidden), dtype=jnp.float32)
    y = jax.random.normal(k_y, (batch, seq, hidden), dtype=jnp.float32)
    gamma = 1.0 + 0.1 * jax.random.normal(k_g, (hidden,), dtype=jnp.float32)
    beta = 0.1 * jax.random.normal(k_b, (hidden,), dtype=jnp.float32)

    # Force the Pallas path for the small demo shape (the default heuristic
    # would route it through the jnp fallback).
    out = add_norm(x, y, gamma, beta, use_pallas=True)
    out = jax.block_until_ready(out)
    ref = _reference_addnorm(x, y, gamma, beta)
    assert out.shape == (batch, seq, hidden)
    assert jnp.allclose(out, ref, atol=5e-5, rtol=5e-5), "mismatch vs reference (small)"

    # Second check: multi-step grid with a ragged last row block and a
    # non-128-multiple feature axis (exercises masked stores / ragged reads).
    M2, d2 = 1200, 96
    x2 = jax.random.normal(k_x2, (M2, d2), dtype=jnp.float32)
    y2 = jax.random.normal(k_y2, (M2, d2), dtype=jnp.float32)
    g2 = jnp.ones((d2,), jnp.float32)
    b2 = jnp.zeros((d2,), jnp.float32)
    out2 = jax.block_until_ready(add_norm(x2, y2, g2, b2))
    ref2 = _reference_addnorm(x2, y2, g2, b2)
    assert jnp.allclose(out2, ref2, atol=5e-5, rtol=5e-5), "mismatch vs reference (ragged)"

    print("KERNEL_OK")
</pallas_src>

<mosaic_0001>
module attributes {stable_mosaic.version = 11 : i64} {
  func.func @_addnorm_kernel(%arg0: i32, %arg1: memref<16x32xf32, #tpu.memory_space<vmem>>, %arg2: memref<16x32xf32, #tpu.memory_space<vmem>>, %arg3: memref<1x32xf32, #tpu.memory_space<vmem>>, %arg4: memref<1x32xf32, #tpu.memory_space<vmem>>, %arg5: memref<16x32xf32, #tpu.memory_space<vmem>>) attributes {dimension_semantics = [#tpu.dimension_semantics<parallel>], iteration_bounds = array<i64: 1>, scalar_prefetch = 0 : i64, scratch_operands = 0 : i64, tpu.core_type = #tpu.core_type<tc>, window_params = [{transform_indices = @transform_0, window_bounds = array<i64: 16, 32>}, {transform_indices = @transform_1, window_bounds = array<i64: 16, 32>}, {pipeline_mode = #tpu.pipeline_mode<synchronous>, transform_indices = @transform_2, window_bounds = array<i64: 1, 32>}, {pipeline_mode = #tpu.pipeline_mode<synchronous>, transform_indices = @transform_3, window_bounds = array<i64: 1, 32>}, {transform_indices = @transform_4, window_bounds = array<i64: 16, 32>}]} {
    %c0 = arith.constant 0 : index
    %c0_0 = arith.constant 0 : index
    %0 = vector.load %arg1[%c0, %c0_0] : memref<16x32xf32, #tpu.memory_space<vmem>>, vector<16x32xf32>
    %c0_1 = arith.constant 0 : index
    %c0_2 = arith.constant 0 : index
    %1 = vector.load %arg2[%c0_1, %c0_2] : memref<16x32xf32, #tpu.memory_space<vmem>>, vector<16x32xf32>
    %2 = arith.addf %0, %1 : vector<16x32xf32>
    %cst = arith.constant dense<0.000000e+00> : vector<16xf32>
    %3 = vector.multi_reduction <add>, %2, %cst [1] : vector<16x32xf32> to vector<16xf32>
    %4 = vector.shape_cast %3 : vector<16xf32> to vector<16x1xf32>
    %cst_3 = arith.constant 3.125000e-02 : f32
    %5 = vector.broadcast %cst_3 : f32 to vector<16x1xf32>
    %6 = arith.mulf %4, %5 : vector<16x1xf32>
    %7 = arith.mulf %2, %2 : vector<16x32xf32>
    %cst_4 = arith.constant dense<0.000000e+00> : vector<16xf32>
    %8 = vector.multi_reduction <add>, %7, %cst_4 [1] : vector<16x32xf32> to vector<16xf32>
    %9 = vector.shape_cast %8 : vector<16xf32> to vector<16x1xf32>
    %cst_5 = arith.constant 3.125000e-02 : f32
    %10 = vector.broadcast %cst_5 : f32 to vector<16x1xf32>
    %11 = arith.mulf %9, %10 : vector<16x1xf32>
    %12 = arith.mulf %6, %6 : vector<16x1xf32>
    %13 = arith.subf %11, %12 : vector<16x1xf32>
    %cst_6 = arith.constant 0.000000e+00 : f32
    %14 = vector.broadcast %cst_6 : f32 to vector<16x1xf32>
    %15 = arith.maximumf %13, %14 : vector<16x1xf32>
    %cst_7 = arith.constant 9.99999974E-6 : f32
    %16 = vector.broadcast %cst_7 : f32 to vector<16x1xf32>
    %17 = arith.addf %15, %16 : vector<16x1xf32>
    %18 = math.rsqrt %17 : vector<16x1xf32>
    %19 = vector.broadcast %6 : vector<16x1xf32> to vector<16x32xf32>
    %20 = arith.subf %2, %19 : vector<16x32xf32>
    %21 = vector.broadcast %18 : vector<16x1xf32> to vector<16x32xf32>
    %22 = arith.mulf %20, %21 : vector<16x32xf32>
    %c0_8 = arith.constant 0 : index
    %c0_9 = arith.constant 0 : index
    %23 = vector.load %arg3[%c0_8, %c0_9] : memref<1x32xf32, #tpu.memory_space<vmem>>, vector<1x32xf32>
    %24 = vector.broadcast %23 : vector<1x32xf32> to vector<16x32xf32>
    %25 = arith.mulf %22, %24 : vector<16x32xf32>
    %c0_10 = arith.constant 0 : index
    %c0_11 = arith.constant 0 : index
    %26 = vector.load %arg4[%c0_10, %c0_11] : memref<1x32xf32, #tpu.memory_space<vmem>>, vector<1x32xf32>
    %27 = vector.broadcast %26 : vector<1x32xf32> to vector<16x32xf32>
    %28 = arith.addf %25, %27 : vector<16x32xf32>
    %c0_12 = arith.constant 0 : index
    %c0_13 = arith.constant 0 : index
    %29 = vector.load %arg5[%c0_12, %c0_13] : memref<16x32xf32, #tpu.memory_space<vmem>>, vector<16x32xf32>
    tpu.vector_store %arg5[%c0_12, %c0_13], %28 {strides = array<i32>} : memref<16x32xf32, #tpu.memory_space<vmem>>, vector<16x32xf32>,
    return
  }
  func.func @transform_0(%arg0: i32) -> (i32, i32) {
    %c0_i32 = arith.constant 0 : i32
    %c0_i32_0 = arith.constant 0 : i32
    return %arg0, %c0_i32 : i32, i32
  }
  func.func @transform_1(%arg0: i32) -> (i32, i32) {
    %c0_i32 = arith.constant 0 : i32
    %c0_i32_0 = arith.constant 0 : i32
    return %arg0, %c0_i32 : i32, i32
  }
  func.func @transform_2(%arg0: i32) -> (i32, i32) {
    %c0_i32 = arith.constant 0 : i32
    %c0_i32_0 = arith.constant 0 : i32
    %c0_i32_1 = arith.constant 0 : i32
    return %c0_i32, %c0_i32_0 : i32, i32
  }
  func.func @transform_3(%arg0: i32) -> (i32, i32) {
    %c0_i32 = arith.constant 0 : i32
    %c0_i32_0 = arith.constant 0 : i32
    %c0_i32_1 = arith.constant 0 : i32
    return %c0_i32, %c0_i32_0 : i32, i32
  }
  func.func @transform_4(%arg0: i32) -> (i32, i32) {
    %c0_i32 = arith.constant 0 : i32
    %c0_i32_0 = arith.constant 0 : i32
    return %arg0, %c0_i32 : i32, i32
  }
}

</mosaic_0001>

<bundles_post_ra>
// kernel: tpu_custom_call.1
= control target key start
LH: loop header
LB: loop body
LE: loop exit
PB: predicated region body
PF: predicated region fallthrough
CT: control target
= control target key end

     0   :  { %9 = vsyncpa [#allocation3], 0  ;;  %s290_s0 = inlined_call_operand.hbm [shape: f32[16,32], index: 0, kind: input, shape index: {}]   ;;  %s291_s1 = inlined_call_operand.hbm [shape: f32[16,32], index: 1, kind: input, shape index: {}]   ;;  %s292_s2 = inlined_call_operand.vmem [shape: f32[1,32], index: 2, kind: input, shape index: {}]   ;;  %s293_s3 = inlined_call_operand.vmem [shape: f32[1,32], index: 3, kind: input, shape index: {}]   ;;  %s294_s4 = inlined_call_operand.hbm [shape: f32[16,32], index: 4, kind: output, shape index: {}]  }
   0x1   :  { %10 = vsyncpa [#allocation6], 0 }
   0x2   :  { %11 = vsyncpa [#allocation4], 0  ;;  %s16_s17 = sshll.u32 %s290_s0, 4  ;;  %s230_s18 = smov [#allocation2]   ;;  %s17_s17 = int_to_ptr.hbm [resolvable:$true] %s16_s17 }
   0x3   :  { %s18_s19 = sshll.u32 %s230_s18, 4  ;;  %s29_s22 = sshll.u32 %s291_s1, 4  ;;  %s19_s19 = int_to_ptr.vmem [resolvable:$true] %s18_s19  ;;  %s30_s22 = int_to_ptr.hbm [resolvable:$true] %s29_s22 }
   0x4   :  { %s231_s23 = smov 128   ;;  %s232_s24 = smov 8  }
   0x5   :  { %24 = dma.hbm_to_vmem [thread:$0]  %s17_s17, 256, %s19_s19, [#allocation3], %s231_s23, %s231_s23, %s232_s24  }
   0x6   :  { %s233_s25 = smov [#allocation5]  }
   0x7   :  { %s31_s26 = sshll.u32 %s233_s25, 4  ;;  %s32_s26 = int_to_ptr.vmem [resolvable:$true] %s31_s26 }
   0x8   :  { %37 = dma.hbm_to_vmem [thread:$0]  %s30_s22, 256, %s32_s26, [#allocation6], %s231_s23, %s231_s23, %s232_s24  }
   0x9   :  { %224 = dma.done.wait [#allocation3], 256  }
   0xa   :  { %225 = vsyncadd [#allocation3], 4294967040 }
   0xb   :  { %226 = dma.done.wait [#allocation6], 256  }
   0xc   :  { %227 = vsyncadd [#allocation6], 4294967040  ;;  %v50_v0 = vld [vmem:[#allocation2] sm:$0xff]  ;;  %v52_v1 = vld [vmem:[#allocation5] sm:$0xff]  ;;  %vm56_vm0 = vcmask 261120   ;;  %s127_s6 = sshll.u32 %s294_s4, 4  ;;  %s128_s6 = int_to_ptr.hbm [resolvable:$true] %s127_s6 }
   0xd   :  { %v51_v2 = vld [vmem:[#allocation2 + $0x8] sm:$0xff]  ;;  %v54_v3 = vadd.f32 %v52_v1, %v50_v0  ;;  %v53_v4 = vld [vmem:[#allocation5 + $0x8] sm:$0xff]  ;;  %v146_v37 = vld [vmem:[%s292_s2] ss:$0 sm:$0xff]  ;;  %s234_s2 = smov [#allocation7]  }
   0xe   :  { %v55_v7 = vadd.f32 %v53_v4, %v51_v2  ;;  %v147_v41 = vld [vmem:[%s293_s3] ss:$0 sm:$0xff]  ;;  %s125_s29 = sshll.u32 %s234_s2, 4  ;;  %s126_s29 = int_to_ptr.vmem [resolvable:$true] %s125_s29 }
   0xf   :  { %v57_v5 = vsel %vm56_vm0, %v54_v3, 0.0  ;;  %v65_v6 = vmul.f32 %v54_v3, %v54_v3 }
  0x10   :  { %58 = vadd.xlane.f32.xlu0 %v57_v5  ;;  %v66_v9 = vmul.f32 %v55_v7, %v55_v7  ;;  %v60_v10 = vsel %vm56_vm0, %v55_v7, 0.0 }
  0x11   :  { %v67_v8 = vsel %vm56_vm0, %v65_v6, 0.0 }
  0x12   :  { %68 = vadd.xlane.f32.xlu1 %v67_v8  ;;  %v70_v11 = vsel %vm56_vm0, %v66_v9, 0.0 }
  0x18   :  { %61 = vadd.xlane.f32.xlu0 %v60_v10 }
  0x1a   :  { %71 = vadd.xlane.f32.xlu1 %v70_v11 }
  0x83   :  { %v59_v12 = vpop.xlane.xlu0 %58 }
  0x84   :  { %v63_v13 = vmul.f32 0.03125, %v59_v12 }
  0x85   :  { %v69_v14 = vpop.xlane.xlu1 %68 }
  0x86   :  { %v75_v15 = vmul.f32 %v63_v13, %v63_v13  ;;  %v73_v16 = vmul.f32 0.03125, %v69_v14  ;;  %v103_v35 = vsub.f32 %v54_v3, %v63_v13 }
  0x88   :  { %v77_v17 = vsub.f32 %v73_v16, %v75_v15 }
  0x8a   :  { %v79_v18 = vmax.f32 %v77_v17, 0.0 }
  0x8b   :  { %v62_v19 = vpop.xlane.xlu0 %61 }
  0x8c   :  { %v81_v20 = vadd.f32 1e-05, %v79_v18  ;;  %v64_v21 = vmul.f32 0.03125, %v62_v19 }
  0x8d   :  { %v72_v22 = vpop.xlane.xlu1 %71 }
  0x8e   :  { %148 = vrsqrt.f32 %v81_v20  ;;  %v76_v23 = vmul.f32 %v64_v21, %v64_v21  ;;  %v74_v24 = vmul.f32 0.03125, %v72_v22  ;;  %vm89_vm2 = vweird.f32 %v81_v20 }
  0x8f   :  { %v104_v47 = vsub.f32 %v55_v7, %v64_v21 }
  0x90   :  { %v78_v25 = vsub.f32 %v74_v24, %v76_v23 }
  0x92   :  { %v80_v26 = vmax.f32 %v78_v25, 0.0 }
  0x94   :  { %v149_v27 = vpop.eup %148  ;;  %v82_v29 = vadd.f32 1e-05, %v80_v26 }
  0x95   :  { %v84_v28 = vmul.f32 %v149_v27, %v81_v20  ;;  %vm90_vm1 = vweird.f32 %v149_v27 }
  0x96   :  { %150 = vrsqrt.f32 %v82_v29  ;;  %vm91_vm3 = vmor %vm89_vm2, %vm90_vm1  ;;  %vm99_vm5 = vweird.f32 %v82_v29 }
  0x97   :  { %v85_v30 = vmul.f32 %v149_v27, %v84_v28 }
  0x99   :  { %v86_v31 = vmul.f32 0.5, %v85_v30 }
  0x9b   :  { %v87_v32 = vsub.f32 1.5, %v86_v31 }
  0x9c   :  { %v151_v33 = vpop.eup %150 }
  0x9d   :  { %v88_v34 = vmul.f32 %v149_v27, %v87_v32  ;;  %v94_v36 = vmul.f32 %v151_v33, %v82_v29  ;;  %vm100_vm4 = vweird.f32 %v151_v33 }
  0x9e   :  { %vm101_vm6 = vmor %vm99_vm5, %vm100_vm4 }
  0x9f   :  { %v92_v38 = vsel %vm91_vm3, %v149_v27, %v88_v34  ;;  %v95_v40 = vmul.f32 %v151_v33, %v94_v36 }
  0xa0   :  { %v105_v39 = vmul.f32 %v103_v35, %v92_v38 }
  0xa1   :  { %v96_v42 = vmul.f32 0.5, %v95_v40 }
  0xa2   :  { %v111_v43 = vmul.f32 %v146_v37, %v105_v39 }
  0xa3   :  { %v97_v44 = vsub.f32 1.5, %v96_v42 }
  0xa4   :  { %v117_v45 = vadd.f32 %v147_v41, %v111_v43 }
  0xa5   :  { %v98_v46 = vmul.f32 %v151_v33, %v97_v44 }
  0xa6   :  { %119 = vst.msk [vmem:[#allocation7] sm:$0xff] %vm56_vm0, %v117_v45 }
  0xa7   :  { %v102_v48 = vsel %vm101_vm6, %v151_v33, %v98_v46 }
  0xa8   :  { %v106_v49 = vmul.f32 %v104_v47, %v102_v48 }
  0xaa   :  { %v112_v50 = vmul.f32 %v146_v37, %v106_v49 }
  0xac   :  { %v118_v51 = vadd.f32 %v147_v41, %v112_v50 }
  0xae   :  { %120 = vst.msk [vmem:[#allocation7 + $0x8] sm:$0xff] %vm56_vm0, %v118_v51 }
  0xaf   :  { %133 = dma.vmem_to_hbm [thread:$0]  %s126_s29, 256, %s128_s6, [#allocation4], %s231_s23, %s231_s23, %s232_s24  }
  0xb0   :  { %228 = dma.done.wait [#allocation4], 256  }
  0xb1   :  { %229 = vsyncadd [#allocation4], 4294967040 }
  0xb2   :  { %138 = vsyncpa [#allocation3], 1 }
  0xb3   :  { %139 = vsyncpa [#allocation6], 1 }
  0xb4   :  { %140 = vsyncpa [#allocation4], 1 }

</bundles_post_ra>
